<compile_context>
chip_gen: v6e
topology: v6e:2x2x1
jax: 0.10.0
libtpu: 0.0.40
codegen_flags: <defaults>
</compile_context>

<pallas_src>
import functools

import jax
import jax.numpy as jnp
from jax.experimental import pallas as pl
from jax.experimental.pallas import tpu as pltpu


# ----------------------------------------------------------------------------
# Fused single-pass kernel: whole (nb, C, HW) block resident in VMEM.
# ----------------------------------------------------------------------------
def _ca_fused_kernel(x_ref, w1_ref, b1_ref, w2_ref, b2_ref, o_ref):
    hw = x_ref.shape[-1]

    # AdaptiveAvgPool2d(1): f32-accumulated mean over the flattened spatial
    # (lane) axis.  Re-read the ref at each use so the multi-MiB block never
    # has to stay live as one value (keeps vreg pressure low).
    pooled = jnp.sum(x_ref[...].astype(jnp.float32), axis=-1) * (1.0 / hw)   # (nb, C)

    # conv_du: two 1x1 convs == tiny matmuls; FLOPs are noise under the DMA.
    h = jnp.dot(pooled, w1_ref[...], preferred_element_type=jnp.float32) + b1_ref[...]
    h = jnp.maximum(h, 0.0)
    y = jnp.dot(h, w2_ref[...], preferred_element_type=jnp.float32) + b2_ref[...]
    y = jax.nn.sigmoid(y)                                                    # (nb, C) f32

    # Channel-wise rescale; y broadcasts along the HW lane axis for free.
    o_ref[...] = (x_ref[...].astype(jnp.float32) * y[:, :, None]).astype(o_ref.dtype)


# ----------------------------------------------------------------------------
# Spatially tiled fallback (large images): pass 1 = pool + attention weights,
# pass 2 = tiled rescale.
# ----------------------------------------------------------------------------
def _ca_pool_attn_kernel(x_ref, w1_ref, b1_ref, w2_ref, b2_ref, y_ref, acc_ref,
                         *, hw_total, tile_hw):
    hw_i = pl.program_id(1)

    @pl.when(hw_i == 0)
    def _():
        acc_ref[...] = jnp.zeros_like(acc_ref)

    # Masked f32 partial sum over this spatial tile (the tail tile may be
    # padded with stale VMEM contents -> mask before accumulating).
    x = x_ref[...].astype(jnp.float32)                                   # (1, C, tile_hw)
    lane = jax.lax.broadcasted_iota(jnp.int32, x.shape, 2) + hw_i * tile_hw
    x = jnp.where(lane < hw_total, x, 0.0)
    acc_ref[...] += jnp.sum(x, axis=-1)                                  # (1, C)

    @pl.when(hw_i == pl.num_programs(1) - 1)
    def _():
        pooled = acc_ref[...] * (1.0 / hw_total)                         # (1, C)
        h = jnp.dot(pooled, w1_ref[...], preferred_element_type=jnp.float32) + b1_ref[...]
        h = jnp.maximum(h, 0.0)
        y = jnp.dot(h, w2_ref[...], preferred_element_type=jnp.float32) + b2_ref[...]
        y_ref[0] = jax.nn.sigmoid(y)                                     # (1, C) -> (1,1,C)


def _ca_rescale_kernel(x_ref, y_ref, o_ref):
    y = y_ref[0]                                                         # (1, C) f32
    o_ref[...] = (x_ref[...].astype(jnp.float32) * y[:, :, None]).astype(o_ref.dtype)


# ----------------------------------------------------------------------------
# Per-generation blocking / VMEM policy.
# ----------------------------------------------------------------------------
def _tpu_policy():
    """Returns (num_tensorcores, vmem_cap_bytes, block_bytes_budget)."""
    kind = ""
    try:
        kind = jax.devices()[0].device_kind.lower()
    except Exception:
        pass
    if "v7" in kind:
        # 2 TensorCores / chip, 64 MiB VMEM per TC -> leave headroom.
        return 2, 48 << 20, 10 << 20
    if "v6" in kind or "v5 lite" in kind or "v5e" in kind or "v5lite" in kind:
        # Single TC, 128 MiB physical VMEM (16/32 MiB is just the scoped default).
        return 1, 96 << 20, 14 << 20
    # Unknown generation: conservative (assume 2 TCs, 64 MiB-class VMEM).
    return 2, 48 << 20, 8 << 20


def ca_layer(x_nchw, w1, b1, w2, b2, *, force_tiled=False, tile_hw=None):
    """CALayer forward.

    x_nchw : (N, C, H, W)
    w1     : (C_red, C, 1, 1), b1: (C_red,)   -- first 1x1 conv
    w2     : (C, C_red, 1, 1), b2: (C,)       -- second 1x1 conv
    returns: (N, C, H, W)

    Note: the output HBM buffer is aliased onto x; if the caller donates x it
    is destroyed (pure rescale, so no extra full-size buffer is needed).
    """
    N, C, H, W = x_nchw.shape
    C_red = w1.shape[0]
    HW = H * W
    itemsize = jnp.dtype(x_nchw.dtype).itemsize
    ncores, vmem_cap, block_budget = _tpu_policy()

    # Free, contiguous HBM reshapes (no transposes, no layout changes).
    x3 = x_nchw.reshape(N, C, HW)
    w1t = w1.reshape(C_red, C).T                 # (C, C_red)
    w2t = w2.reshape(C, C_red).T                 # (C_red, C)
    b1r = b1.reshape(1, C_red)
    b2r = b2.reshape(1, C)

    weight_bytes = (2 * C * C_red + C + C_red) * 4
    slack = (2 << 20) + weight_bytes
    per_batch_bytes = C * HW * itemsize
    # A fused block must fit double-buffered (input + aliased output) under
    # the per-generation VMEM cap.
    max_fused_block = (vmem_cap - slack) // 4
    use_fused = (per_batch_bytes <= min(block_budget, max_fused_block)) and not force_tiled

    if use_fused:
        # Pack batch elements per grid step to amortize the ~0.35us/step
        # overhead; cdiv grid, so no divisibility requirement on N (padded
        # tail rows are masked on store and never contaminate valid rows).
        nb = max(1, min(N, block_budget // per_batch_bytes))
        if ncores >= 2 and N >= 2:
            # Both TensorCores must get work -> at least 2 grid steps, and
            # prefer an even step count so both cores finish together.
            nb = min(nb, pl.cdiv(N, 2))
            if pl.cdiv(N, nb) % 2 == 1:
                for cand in range(nb, 0, -1):
                    if pl.cdiv(N, cand) % 2 == 0:
                        nb = cand
                        break
        grid = (pl.cdiv(N, nb),)
        block_bytes = nb * per_batch_bytes
        vmem_limit = int(min(vmem_cap, max(16 << 20, 4 * block_bytes + slack)))

        cost = pl.CostEstimate(
            flops=2 * N * C * HW + 4 * N * C * C_red,
            transcendentals=N * C,
            bytes_accessed=2 * N * C * HW * itemsize,
        )

        out3 = pl.pallas_call(
            _ca_fused_kernel,
            out_shape=jax.ShapeDtypeStruct((N, C, HW), x_nchw.dtype),
            grid_spec=pltpu.PrefetchScalarGridSpec(
                num_scalar_prefetch=0,
                grid=grid,
                in_specs=[
                    pl.BlockSpec((nb, C, HW), lambda n: (n, 0, 0)),
                    pl.BlockSpec((C, C_red), lambda n: (0, 0)),
                    pl.BlockSpec((1, C_red), lambda n: (0, 0)),
                    pl.BlockSpec((C_red, C), lambda n: (0, 0)),
                    pl.BlockSpec((1, C), lambda n: (0, 0)),
                ],
                out_specs=pl.BlockSpec((nb, C, HW), lambda n: (n, 0, 0)),
            ),
            compiler_params=pltpu.CompilerParams(
                dimension_semantics=("parallel",),
                vmem_limit_bytes=vmem_limit,
            ),
            input_output_aliases={0: 0},
            cost_estimate=cost,
        )(x3, w1t, b1r, w2t, b2r)
        return out3.reshape(N, C, H, W)

    # ----- Spatially tiled fallback: a single batch element does not fit ----
    # Costs 3 HBM passes over x (vs the 2-pass fused floor) but bounds VMEM to
    # a few MiB and keeps both v7x TensorCores busy even at N=1.
    if tile_hw is None:
        tile_budget = min(block_budget, max_fused_block)
        tile_hw = max(128, (tile_budget // (C * itemsize)) // 128 * 128)
    if tile_hw >= HW:
        tile_hw = HW
    n_hw = pl.cdiv(HW, tile_hw)
    tile_bytes = C * tile_hw * itemsize
    vmem_limit = int(min(vmem_cap, max(16 << 20, 4 * tile_bytes + slack)))

    # Pass 1: pooled mean + channel attention weights y (f32, (N, 1, C)).
    pool_cost = pl.CostEstimate(
        flops=2 * N * C * HW + 4 * N * C * C_red,
        transcendentals=N * C,
        bytes_accessed=N * C * HW * itemsize + N * C * 4,
    )
    y_attn = pl.pallas_call(
        functools.partial(_ca_pool_attn_kernel, hw_total=HW, tile_hw=tile_hw),
        out_shape=jax.ShapeDtypeStruct((N, 1, C), jnp.float32),
        grid_spec=pltpu.PrefetchScalarGridSpec(
            num_scalar_prefetch=0,
            grid=(N, n_hw),
            in_specs=[
                pl.BlockSpec((1, C, tile_hw), lambda n, h: (n, 0, h)),
                pl.BlockSpec((C, C_red), lambda n, h: (0, 0)),
                pl.BlockSpec((1, C_red), lambda n, h: (0, 0)),
                pl.BlockSpec((C_red, C), lambda n, h: (0, 0)),
                pl.BlockSpec((1, C), lambda n, h: (0, 0)),
            ],
            out_specs=pl.BlockSpec((1, 1, C), lambda n, h: (n, 0, 0)),
            scratch_shapes=[pltpu.VMEM((1, C), jnp.float32)],
        ),
        compiler_params=pltpu.CompilerParams(
            dimension_semantics=("parallel", "arbitrary"),
            vmem_limit_bytes=vmem_limit,
        ),
        cost_estimate=pool_cost,
    )(x3, w1t, b1r, w2t, b2r)

    # Pass 2: lane-dense spatially tiled rescale, fully parallel grid.
    rescale_cost = pl.CostEstimate(
        flops=N * C * HW,
        transcendentals=0,
        bytes_accessed=2 * N * C * HW * itemsize,
    )
    out3 = pl.pallas_call(
        _ca_rescale_kernel,
        out_shape=jax.ShapeDtypeStruct((N, C, HW), x_nchw.dtype),
        grid_spec=pltpu.PrefetchScalarGridSpec(
            num_scalar_prefetch=0,
            grid=(N, n_hw),
            in_specs=[
                pl.BlockSpec((1, C, tile_hw), lambda n, h: (n, 0, h)),
                pl.BlockSpec((1, 1, C), lambda n, h: (n, 0, 0)),
            ],
            out_specs=pl.BlockSpec((1, C, tile_hw), lambda n, h: (n, 0, h)),
        ),
        compiler_params=pltpu.CompilerParams(
            dimension_semantics=("parallel", "parallel"),
            vmem_limit_bytes=vmem_limit,
        ),
        input_output_aliases={0: 0},
        cost_estimate=rescale_cost,
    )(x3, y_attn)
    return out3.reshape(N, C, H, W)


def _reference(x, w1, b1, w2, b2):
    C_red, C = w1.shape[0], w1.shape[1]
    pooled = jnp.mean(x, axis=(2, 3))                                    # (N, C)
    h = jnp.maximum(pooled @ w1.reshape(C_red, C).T + b1, 0.0)           # (N, C_red)
    y = jax.nn.sigmoid(h @ w2.reshape(C, C_red).T + b2)                  # (N, C)
    return x * y[:, :, None, None]


if __name__ == "__main__":
    key = jax.random.PRNGKey(0)

    # --- Test 1: fused single-pass path -------------------------------------
    N, C, H, W = 2, 32, 16, 16
    reduction = 16
    C_red = C // reduction
    kx, k1, k2, k3, k4, key = jax.random.split(key, 6)
    x = jax.random.normal(kx, (N, C, H, W), jnp.float32)
    bound1 = 1.0 / (C ** 0.5)
    w1 = jax.random.uniform(k1, (C_red, C, 1, 1), jnp.float32, -bound1, bound1)
    b1 = jax.random.uniform(k2, (C_red,), jnp.float32, -bound1, bound1)
    bound2 = 1.0 / (C_red ** 0.5)
    w2 = jax.random.uniform(k3, (C, C_red, 1, 1), jnp.float32, -bound2, bound2)
    b2 = jax.random.uniform(k4, (C,), jnp.float32, -bound2, bound2)

    ref = jax.block_until_ready(_reference(x, w1, b1, w2, b2))
    out = jax.block_until_ready(ca_layer(x, w1, b1, w2, b2))
    assert out.shape == (N, C, H, W)
    assert jnp.allclose(out, ref, atol=1e-5, rtol=1e-5), "fused path mismatch"

    # --- Test 2: spatially tiled fallback (forced; partial tail tile) -------
    N2, C2, H2, W2 = 1, 16, 20, 20
    red2 = 4
    C_red2 = C2 // red2
    kx, k1, k2, k3, k4, key = jax.random.split(key, 6)
    x2 = jax.random.normal(kx, (N2, C2, H2, W2), jnp.float32)
    bound1 = 1.0 / (C2 ** 0.5)
    w1b = jax.random.uniform(k1, (C_red2, C2, 1, 1), jnp.float32, -bound1, bound1)
    b1b = jax.random.uniform(k2, (C_red2,), jnp.float32, -bound1, bound1)
    bound2 = 1.0 / (C_red2 ** 0.5)
    w2b = jax.random.uniform(k3, (C2, C_red2, 1, 1), jnp.float32, -bound2, bound2)
    b2b = jax.random.uniform(k4, (C2,), jnp.float32, -bound2, bound2)

    ref2 = jax.block_until_ready(_reference(x2, w1b, b1b, w2b, b2b))
    out2 = jax.block_until_ready(
        ca_layer(x2, w1b, b1b, w2b, b2b, force_tiled=True, tile_hw=128))
    assert out2.shape == (N2, C2, H2, W2)
    assert jnp.allclose(out2, ref2, atol=1e-5, rtol=1e-5), "tiled path mismatch"

    print("KERNEL_OK")
</pallas_src>

<mosaic_0001>
module attributes {stable_mosaic.version = 11 : i64} {
  func.func @_ca_fused_kernel(%arg0: i32, %arg1: memref<1x32x256xf32, #tpu.memory_space<vmem>>, %arg2: memref<32x2xf32, #tpu.memory_space<vmem>>, %arg3: memref<1x2xf32, #tpu.memory_space<vmem>>, %arg4: memref<2x32xf32, #tpu.memory_space<vmem>>, %arg5: memref<1x32xf32, #tpu.memory_space<vmem>>, %arg6: memref<1x32x256xf32, #tpu.memory_space<vmem>>) attributes {dimension_semantics = [#tpu.dimension_semantics<parallel>], iteration_bounds = array<i64: 2>, scalar_prefetch = 0 : i64, scratch_operands = 0 : i64, tpu.core_type = #tpu.core_type<tc>, window_params = [{transform_indices = @transform_0, window_bounds = array<i64: 1, 32, 256>}, {pipeline_mode = #tpu.pipeline_mode<synchronous>, transform_indices = @transform_1, window_bounds = array<i64: 32, 2>}, {pipeline_mode = #tpu.pipeline_mode<synchronous>, transform_indices = @transform_2, window_bounds = array<i64: 1, 2>}, {pipeline_mode = #tpu.pipeline_mode<synchronous>, transform_indices = @transform_3, window_bounds = array<i64: 2, 32>}, {pipeline_mode = #tpu.pipeline_mode<synchronous>, transform_indices = @transform_4, window_bounds = array<i64: 1, 32>}, {transform_indices = @transform_5, window_bounds = array<i64: 1, 32, 256>}]} {
    %c0 = arith.constant 0 : index
    %c0_0 = arith.constant 0 : index
    %c0_1 = arith.constant 0 : index
    %0 = vector.load %arg1[%c0, %c0_0, %c0_1] : memref<1x32x256xf32, #tpu.memory_space<vmem>>, vector<1x32x256xf32>
    %cst = arith.constant dense<0.000000e+00> : vector<1x32xf32>
    %1 = vector.multi_reduction <add>, %0, %cst [2] : vector<1x32x256xf32> to vector<1x32xf32>
    %cst_2 = arith.constant 3.906250e-03 : f32
    %2 = vector.broadcast %cst_2 : f32 to vector<1x32xf32>
    %3 = arith.mulf %1, %2 : vector<1x32xf32>
    %c0_3 = arith.constant 0 : index
    %c0_4 = arith.constant 0 : index
    %4 = vector.load %arg2[%c0_3, %c0_4] : memref<32x2xf32, #tpu.memory_space<vmem>>, vector<32x2xf32>
    %cst_5 = arith.constant dense<0.000000e+00> : vector<1x2xf32>
    %5 = tpu.matmul %3, %4, %cst_5 {dimension_numbers = #tpu.dot_dimension_numbers<[1], [0], [0], [1], [0, 0, 1, 1], [], []>} : vector<1x32xf32>, vector<32x2xf32>, vector<1x2xf32> -> vector<1x2xf32>
    %c0_6 = arith.constant 0 : index
    %c0_7 = arith.constant 0 : index
    %6 = vector.load %arg3[%c0_6, %c0_7] : memref<1x2xf32, #tpu.memory_space<vmem>>, vector<1x2xf32>
    %7 = arith.addf %5, %6 : vector<1x2xf32>
    %cst_8 = arith.constant 0.000000e+00 : f32
    %8 = vector.broadcast %cst_8 : f32 to vector<1x2xf32>
    %9 = arith.maximumf %7, %8 : vector<1x2xf32>
    %c0_9 = arith.constant 0 : index
    %c0_10 = arith.constant 0 : index
    %10 = vector.load %arg4[%c0_9, %c0_10] : memref<2x32xf32, #tpu.memory_space<vmem>>, vector<2x32xf32>
    %cst_11 = arith.constant dense<0.000000e+00> : vector<1x32xf32>
    %11 = tpu.matmul %9, %10, %cst_11 {dimension_numbers = #tpu.dot_dimension_numbers<[1], [0], [0], [1], [0, 0, 1, 1], [], []>} : vector<1x2xf32>, vector<2x32xf32>, vector<1x32xf32> -> vector<1x32xf32>
    %c0_12 = arith.constant 0 : index
    %c0_13 = arith.constant 0 : index
    %12 = vector.load %arg5[%c0_12, %c0_13] : memref<1x32xf32, #tpu.memory_space<vmem>>, vector<1x32xf32>
    %13 = arith.addf %11, %12 : vector<1x32xf32>
    %14 = arith.negf %13 : vector<1x32xf32>
    %15 = math.exp %14 : vector<1x32xf32>
    %cst_14 = arith.constant 1.000000e+00 : f32
    %16 = vector.broadcast %cst_14 : f32 to vector<1x32xf32>
    %17 = arith.addf %16, %15 : vector<1x32xf32>
    %18 = arith.divf %16, %17 : vector<1x32xf32>
    %c0_15 = arith.constant 0 : index
    %c0_16 = arith.constant 0 : index
    %c0_17 = arith.constant 0 : index
    %19 = vector.load %arg1[%c0_15, %c0_16, %c0_17] : memref<1x32x256xf32, #tpu.memory_space<vmem>>, vector<1x32x256xf32>
    %20 = vector.shape_cast %18 : vector<1x32xf32> to vector<1x32x1xf32>
    %21 = vector.broadcast %20 : vector<1x32x1xf32> to vector<1x32x256xf32>
    %22 = arith.mulf %19, %21 : vector<1x32x256xf32>
    %c0_18 = arith.constant 0 : index
    %c0_19 = arith.constant 0 : index
    %c0_20 = arith.constant 0 : index
    %23 = vector.load %arg6[%c0_18, %c0_19, %c0_20] : memref<1x32x256xf32, #tpu.memory_space<vmem>>, vector<1x32x256xf32>
    tpu.vector_store %arg6[%c0_18, %c0_19, %c0_20], %22 {strides = array<i32>} : memref<1x32x256xf32, #tpu.memory_space<vmem>>, vector<1x32x256xf32>,
    return
  }
  func.func @transform_0(%arg0: i32) -> (i32, i32, i32) {
    %c0_i32 = arith.constant 0 : i32
    %c0_i32_0 = arith.constant 0 : i32
    %c0_i32_1 = arith.constant 0 : i32
    return %arg0, %c0_i32, %c0_i32_0 : i32, i32, i32
  }
  func.func @transform_1(%arg0: i32) -> (i32, i32) {
    %c0_i32 = arith.constant 0 : i32
    %c0_i32_0 = arith.constant 0 : i32
    %c0_i32_1 = arith.constant 0 : i32
    return %c0_i32, %c0_i32_0 : i32, i32
  }
  func.func @transform_2(%arg0: i32) -> (i32, i32) {
    %c0_i32 = arith.constant 0 : i32
    %c0_i32_0 = arith.constant 0 : i32
    %c0_i32_1 = arith.constant 0 : i32
    return %c0_i32, %c0_i32_0 : i32, i32
  }
  func.func @transform_3(%arg0: i32) -> (i32, i32) {
    %c0_i32 = arith.constant 0 : i32
    %c0_i32_0 = arith.constant 0 : i32
    %c0_i32_1 = arith.constant 0 : i32
    return %c0_i32, %c0_i32_0 : i32, i32
  }
  func.func @transform_4(%arg0: i32) -> (i32, i32) {
    %c0_i32 = arith.constant 0 : i32
    %c0_i32_0 = arith.constant 0 : i32
    %c0_i32_1 = arith.constant 0 : i32
    return %c0_i32, %c0_i32_0 : i32, i32
  }
  func.func @transform_5(%arg0: i32) -> (i32, i32, i32) {
    %c0_i32 = arith.constant 0 : i32
    %c0_i32_0 = arith.constant 0 : i32
    %c0_i32_1 = arith.constant 0 : i32
    return %arg0, %c0_i32, %c0_i32_0 : i32, i32, i32
  }
}

</mosaic_0001>

<bundles_post_ra>
// kernel: tpu_custom_call.1
= control target key start
LH: loop header
LB: loop body
LE: loop exit
PB: predicated region body
PF: predicated region fallthrough
CT: control target
= control target key end

     0   :  { %10 = vsyncpa [#allocation3], 0  ;;  %s1027_s0 = inlined_call_operand.hbm [shape: f32[2,32,256], index: 0, kind: input, shape index: {}, may-alias: {0,5}]   ;;  %s1028_s1 = inlined_call_operand.vmem [shape: f32[32,2], index: 1, kind: input, shape index: {}]   ;;  %s1029_s2 = inlined_call_operand.vmem [shape: f32[1,2], index: 2, kind: input, shape index: {}]   ;;  %s1030_s3 = inlined_call_operand.vmem [shape: f32[2,32], index: 3, kind: input, shape index: {}]   ;;  %s1031_s4 = inlined_call_operand.vmem [shape: f32[1,32], index: 4, kind: input, shape index: {}]   ;;  %s1032_s5 = inlined_call_operand.hbm [shape: f32[2,32,256], index: 5, kind: output, shape index: {}, may-alias: {0,5}]  }
   0x1   :  { %12 = vsyncpa [#allocation3 + $0x1], 0 }
   0x2   :  { %13 = vsyncpa [#allocation4], 0 }
   0x3   :  { %15 = vsyncpa [#allocation4 + $0x1], 0  ;;  %s816_s18 = smov 0   ;;  %s818_s19 = smov 0  }
   0x4   :  { %s820_s20 = smov 0   ;;  %s822_s21 = smov 0  }
   0x5 LB: > { %s837_s22 = sadd.s32 4294967295, %s776_s21   ;;  %s585_s23 = sadd.s32 4294967294, %s776_s21   ;;  %s776_s21 = sphi %s822_s21, %s1047_s21   ;;  %s772_s20 = sphi %s820_s20, %s1046_s20   ;;  %s768_s19 = sphi %s818_s19, %s1045_s19   ;;  %s764_s18 = sphi %s816_s18, %s1044_s18  }
   0x6   : > { %s841_s24 = sadd.s32 1, %s776_s21   ;;  %s28_s25 = sadd.s32 1, %s772_s20 }
   0x7   : > { %s25_s26 = ssub.s32 %s776_s21, %s841_s24  ;;  %p35_p0 = scmp.ne.s32.totalorder %s772_s20, %s768_s19 }
   0x8   : > { %p26_p1 = scmp.eq.s32.totalorder %s25_s26, 0  ;;  %p36_p2 = scmp.eq.s32.totalorder %s776_s21, 0 }
   0x9   : > { %p41_p3 = scmp.ne.s32.totalorder %s768_s19, %s764_s18  ;;  %p42_p4 = scmp.eq.s32.totalorder %s837_s22, 0 }
   0xa   : > { %s853_s27 = scalar_select %p26_p1, %s772_s20, %s28_s25  }
   0xb   : > { %p855_p5 = por %p36_p2, %p35_p0  ;;  %p859_p6 = por %p42_p4, %p41_p3 }
   0xc   : > { %p149_p7 = scmp.eq.s32.totalorder %s837_s22, 1  ;;  %p155_p8 = scmp.eq.s32.totalorder %s585_s23, 1 }
   0xd   : > { %s1036_s29 = scalar_select %p859_p6, 1, 0 }
   0xe   : > { %p640_p10 = scmp.lt.s32.totalorder %s776_s21, 2  ;;  %p866_p11 = por %p149_p7, %p35_p0 }
   0xf   : > { %p870_p12 = por %p155_p8, %p41_p3  ;;  %s187_s7 = sand.u32 1, %s772_s20  }
  0x10   : > { %s1037_s30 = scalar_select %p866_p11, 1, 0 }
  0x11   : > { %s1038_s6 = scalar_select %p870_p12, 1, 0 }
  0x12   : > { %s603_s8 = sshll.u32 %s776_s21, 10  ;;  %s588_s9 = sshll.u32 %s187_s7, 6 }
  0x13   : > { %s879_s12 = scalar_lea.hbm %s1027_s0, %s603_s8  ;;  %s191_s13 = scalar_lea.vmem [#allocation2], %s588_s9 }
  0x14   : > { %s198_s14 = sshll.u32 %s191_s13, 4  ;;  %p883_p13 = pnand %p640_p10, %p855_p5  ;;  %s887_s14 = int_to_ptr.vmem [resolvable:$true] %s198_s14 }
  0x15   : > { %s889_s16 = scalar_lea.sflag [#allocation3], %s187_s7  ;;  %s684_s17 = scalar_lea.hbm %s879_s12, 1024 }
  0x16   : > { %p685_p0 = scmp.ne.s32.totalorder %s879_s12, %s684_s17  ;;  %p686_p1 = pneg %p883_p13 }
  0x17   : > { %s689_s26 = scalar_lea.hbm %s1027_s0, 2048  ;;  %p690_p4 = scmp.lt.s32.totalorder %s879_s12, %s1027_s0 }
  0x18   : > { %p687_p2 = pnand %p686_p1, %p685_p0  ;;  %p691_p5 = scmp.lt.s32.totalorder %s689_s26, %s684_s17 }
  0x1a   : > { %p688_p3 = pneg %p687_p2  ;;  %p692_p7 = por %p691_p5, %p690_p4 }
  0x1c   : > { %p693_p8 = pnand %p692_p7, %p688_p3 }
  0x1e   : > { %696 = shalt.err (!%p693_p8)
}
  0x1f   : > { %s697_s7 = scalar_lea.vmem %s887_s14, 1024  ;;  %s778_s9 = smov [#allocation2]  }
  0x20   : > { %p698_p10 = scmp.ne.s32.totalorder %s887_s14, %s697_s7  ;;  %s702_s10 = sshll.u32 %s778_s9, 4  ;;  %s703_s10 = int_to_ptr.vmem [resolvable:$false] %s702_s10 }
  0x21   : > { %s704_s11 = scalar_lea.vmem %s703_s10, 2048  ;;  %p705_p2 = scmp.lt.s32.totalorder %s887_s14, %s703_s10 }
  0x22   : > { %p700_p9 = pnand %p698_p10, %p686_p1  ;;  %p706_p12 = scmp.lt.s32.totalorder %s704_s11, %s697_s7 }
  0x24   : > { %p701_p0 = pneg %p700_p9  ;;  %p707_p11 = por %p706_p12, %p705_p2 }
  0x26   : > { %p708_p6 = pnand %p707_p11, %p701_p0 }
  0x28   : > { %711 = shalt.err (!%p708_p6)
}
  0x29   : > { %s779_s13 = smov 256   ;;  %s780_s17 = smov 16  }
  0x2a   : > { %635 = dma.hbm_to_vmem [thread:$0]  (!%p883_p13), %s879_s12, 1024, %s887_s14, %s889_s16, %s779_s13, %s779_s13, %s780_s17  }
  0x2b   : > { %p591_p9 = scmp.ge.s32.totalorder %s776_s21, 1  ;;  %p206_p1 = scmp.lt.s32.totalorder %s776_s21, 3 }
  0x2d   : > { %p207_p3 = pnand %p591_p9, %p206_p1 }
  0x2e   : > { %s913_s23 = sand.u32 (!%p207_p3), 1, %s768_s19   ;;  %p1040_p6 = scmp.ne.s32.totalorder (!%p207_p3), %s1036_s29, 0 }
  0x2f   : > { %210 = sbr.rel (%p207_p3) target bundleno = 770 (0x302), region = 40  ;;  %s592_s25 = sshll.u32 (!%p207_p3), %s913_s23, 6 }
  0x30   : > { %s213_s26 = scalar_lea.sflag (!%p207_p3), [#allocation3], %s913_s23  ;;  %s216_s28 = scalar_lea.vmem (!%p207_p3), [#allocation2], %s592_s25 }
  0x34   : > { %755 = dma.done.wait (%p1040_p6), %s213_s26, 1024  }
  0x35   : > { %757 = vsyncadd (%p1040_p6), %s213_s26, 4294966272  ;;  %v923_v0 = vld [vmem:[%s216_s28] sm:$0xff]  ;;  %v925_v1 = vld [vmem:[%s216_s28 + $0x8] sm:$0xff]  ;;  %v781_v12 = vmov 0.0   ;;  %vm782_vm0 = vmmov 0   ;;  %v276_v17 = vlaneseq  ;;  %vm287_vm1 = vcmask 130112  }
  0x36   : > { %v927_v2 = vld [vmem:[%s216_s28 + $0x20] sm:$0xff]  ;;  %v251_v3 = vadd.f32 %v925_v1, %v923_v0  ;;  %v931_v4 = vld [vmem:[%s216_s28 + $0x28] sm:$0xff]  ;;  %v933_v5 = vld [vmem:[%s216_s28 + $0x10] sm:$0xff]  ;;  %612 = vmatprep.subr.mxu0 %v781_v12  ;;  %623 = vmatprep.subr.mxu1 %v781_v12  ;;  %vm294_vm2 = vcmask 195712   ;;  %vm301_vm3 = vcmask 261312   ;;  %vm303_vm4 = vcmask 261120  }
  0x37   : > { %v935_v6 = vld [vmem:[%s216_s28 + $0x18] sm:$0xff]  ;;  %v257_v7 = vadd.f32 %v931_v4, %v927_v2  ;;  %v939_v8 = vld [vmem:[%s216_s28 + $0x30] sm:$0xff]  ;;  %v268_v15 = vld [vmem:[%s1028_s1 + $0x8] sm:$0xff]  ;;  %620 = vmatprep.mubr.msk.f32.mxu0 %vm782_vm0, %v781_v12  ;;  %625 = vmatprep.mubr.msk.f32.mxu1 %vm782_vm0, %v781_v12  ;;  %v277_v18 = vand.u32 127, %v276_v17  ;;  %v279_v19 = vshrl.u32 %v276_v17, 7  ;;  %vm383_vm5 = vcmask 1041408  }
  0x38   : > { %v941_v9 = vld [vmem:[%s216_s28 + $0x38] sm:$0xff]  ;;  %252 = vadd.xlane.f32.xlu0 %v251_v3  ;;  %v254_v10 = vadd.f32 %v935_v6, %v933_v5  ;;  %v269_v14 = vld [vmem:[%s1028_s1 + $0x10] sm:$0xff]  ;;  %v267_v16 = vld [vmem:[%s1028_s1] sm:$0xff]  ;;  %vm379_vm6 = vcmask 15360   ;;  %s242_s29 = scalar_lea.vmem [#allocation5], %s592_s25  ;;  %s604_s14 = sshll.u32 %s837_s22, 10 }
  0x39   : > { %258 = vadd.xlane.f32.xlu1 %v257_v7  ;;  %v260_v11 = vadd.f32 %v941_v9, %v939_v8  ;;  %v270_v13 = vld [vmem:[%s1028_s1 + $0x18] sm:$0xff]  ;;  %v282_v20 = vadd.s32 4294967288, %v277_v18  ;;  %v289_v22 = vadd.s32 4294967280, %v277_v18  ;;  %v296_v23 = vadd.s32 4294967272, %v277_v18  ;;  %v377_v42 = vld [vmem:[%s1030_s3] sm:$0x3]  ;;  %s982_s16 = scalar_lea.hbm %s1032_s5, %s604_s14 }
  0x3a   : > { %613 = vmatpush3.msra.mxu0 %v270_v13  ;;  %v280_v25 = vsub.s32 %v277_v18, %v279_v19  ;;  %624 = vmatpush3.msk.msra.mxu1 %vm383_vm5, %v377_v42  ;;  %v271_v43 = vld [vmem:[%s1029_s2] sm:$0x1]  ;;  %v465_v55 = vsub.s32 0, %v279_v19  ;;  %s512_s12 = sshll.u32 %s242_s29, 4  ;;  %s499_s22 = scalar_lea.sflag [#allocation4], %s913_s23  ;;  %s977_s12 = int_to_ptr.vmem [resolvable:$true] %s512_s12 }
  0x3b   : > { %614 = vmatprep.subr.mxu0 %v781_v12  ;;  %v285_v27 = vsub.s32 %v282_v20, %v279_v19  ;;  %v292_v28 = vsub.s32 %v289_v22, %v279_v19  ;;  %v299_v31 = vsub.s32 %v296_v23, %v279_v19  ;;  %v378_v48 = vld [vmem:[%s1031_s4] sm:$0x1]  ;;  %s712_s8 = scalar_lea.vmem %s977_s12, 1024  ;;  %p1041_p12 = scmp.ne.s32.totalorder %s1037_s30, 0 }
  0x3c   : > { %255 = vadd.xlane.f32.xlu0 %v254_v10  ;;  %615 = vmatpush3.msra.mxu0 %v269_v14  ;;  %p713_p11 = scmp.ne.s32.totalorder %s977_s12, %s712_s8  ;;  %s783_s7 = smov [#allocation5]  }
  0x3d   : > { %261 = vadd.xlane.f32.xlu1 %v260_v11  ;;  %616 = vmatprep.subr.mxu0 %v781_v12  ;;  %s716_s9 = sshll.u32 %s783_s7, 4  ;;  %s717_s9 = int_to_ptr.vmem [resolvable:$false] %s716_s9 }
  0x3e   : > { %617 = vmatpush3.msra.mxu0 %v268_v15  ;;  %p714_p13 = pnand %p713_p11, %p1041_p12  ;;  %s718_s10 = scalar_lea.vmem %s717_s9, 2048 }
  0x3f   : > { %618 = vmatprep.subr.mxu0 %v781_v12  ;;  %p719_p5 = scmp.lt.s32.totalorder %s977_s12, %s717_s9  ;;  %p720_p7 = scmp.lt.s32.totalorder %s718_s10, %s712_s8 }
  0x40   : > { %619 = vmatpush3.msra.mxu0 %v267_v16  ;;  %p715_p4 = pneg %p714_p13 }
  0x41   : > { %p721_p8 = por %p720_p7, %p719_p5 }
  0x43   : > { %p722_p10 = pnand %p721_p8, %p715_p4 }
  0xc1   : > { %v253_v21 = vpop.xlane.xlu0 %252 }
  0xc2   : > { %v259_v24 = vpop.xlane.xlu1 %258  ;;  %v263_v26 = vmul.f32 0.00390625, %v253_v21 }
  0xc3   : > { %v265_v29 = vmul.f32 0.00390625, %v259_v24 }
  0xc4   : > { %v281_v35 = vrot.slane %v263_v26, %v280_v25 }
  0xc5   : > { %v256_v30 = vpop.xlane.xlu0 %255  ;;  %v293_v37 = vrot.slane %v265_v29, %v292_v28 }
  0xc6   : > { %v264_v32 = vmul.f32 0.00390625, %v256_v30  ;;  %v262_v33 = vpop.xlane.xlu1 %261 }
  0xc7   : > { %v266_v34 = vmul.f32 0.00390625, %v262_v33 }
  0xc8   : > { %v286_v36 = vrot.slane %v264_v32, %v285_v27 }
  0xc9   : > { %v300_v38 = vrot.slane %v266_v34, %v299_v31 }
  0xca   : > { %v288_v39 = vsel %vm287_vm1, %v286_v36, %v281_v35 }
  0xcb   : > { %v295_v40 = vsel %vm294_vm2, %v293_v37, %v288_v39 }
  0xcc   : > { %v302_v41 = vsel %vm301_vm3, %v300_v38, %v295_v40 }
  0xcd   : > { %621 = vmatmul.mubr.msk.f32.vlgmr.msra.gmra.mxu0 %vm303_vm4, %v302_v41 }
 0x18d   : > { %v372_v44 = vpop.f32.mrf.mxu0 }
 0x18e   : > { %v373_v45 = vadd.f32 %v372_v44, %v271_v43 }
 0x18f   : > { %v622_v46 = vpop.f32.mrf.mxu0 }
 0x190   : > { %v376_v47 = vmax.f32 %v373_v45, 0.0 }
 0x192   : > { %626 = vmatmul.mubr.msk.f32.vlgmr.msra.gmra.mxu1 %vm379_vm6, %v376_v47 }
 0x252   : > { %v453_v49 = vpop.f32.mrf.mxu1 }
 0x253   : > { %v454_v50 = vadd.f32 %v453_v49, %v378_v48 }
 0x254   : > { %v627_v51 = vpop.f32.mrf.mxu1 }
 0x255   : > { %v597_v52 = vmul.f32 -1.442695, %v454_v50 }
 0x257   : > { %680 = vpow2.f32 %v597_v52 }
 0x264   : > { %v681_v53 = vpop.eup %680 }
 0x265   : > { %v460_v54 = vadd.f32 1.0, %v681_v53 }
 0x267   : > { %682 = vrcp.f32 %v460_v54 }
 0x274   : > { %v683_v56 = vpop.eup %682 }
 0x275   : > { %v466_v57 = vrot.slane %v683_v56, %v465_v55 }
 0x277   : > { %472 = vbcast.lane.b32.xlu1 %v466_v57, 264  ;;  %468 = vbcast.lane.b32.xlu0 %v466_v57, 256 }
 0x27b   : > { %476 = vbcast.lane.b32.xlu1 %v466_v57, 272 }
 0x27f   : > { %480 = vbcast.lane.b32.xlu1 %v466_v57, 280 }
 0x2e9   : > { %v473_v58 = vpop.permute.xlu1 %472  ;;  %v469_v59 = vpop.permute.xlu0 %468 }
 0x2ea   : > { %v484_v60 = vmul.f32 %v473_v58, %v933_v5  ;;  %v485_v61 = vmul.f32 %v473_v58, %v935_v6  ;;  %v482_v62 = vmul.f32 %v469_v59, %v923_v0  ;;  %v483_v63 = vmul.f32 %v469_v59, %v925_v1 }
 0x2ec   : > { %492 = vst [vmem:[%s242_s29 + $0x10] sm:$0xff] %v484_v60  ;;  %493 = vst [vmem:[%s242_s29 + $0x18] sm:$0xff] %v485_v61 }
 0x2ed   : > { %490 = vst [vmem:[%s242_s29] sm:$0xff] %v482_v62  ;;  %491 = vst [vmem:[%s242_s29 + $0x8] sm:$0xff] %v483_v63  ;;  %v477_v3 = vpop.permute.xlu1 %476 }
 0x2ee   : > { %v486_v7 = vmul.f32 %v477_v3, %v927_v2  ;;  %v487_v5 = vmul.f32 %v477_v3, %v931_v4 }
 0x2f0   : > { %494 = vst [vmem:[%s242_s29 + $0x20] sm:$0xff] %v486_v7  ;;  %495 = vst [vmem:[%s242_s29 + $0x28] sm:$0xff] %v487_v5 }
 0x2f1   : > { %v481_v0 = vpop.permute.xlu1 %480 }
 0x2f2   : > { %v488_v1 = vmul.f32 %v481_v0, %v939_v8  ;;  %v489_v2 = vmul.f32 %v481_v0, %v941_v9 }
 0x2f4   : > { %496 = vst [vmem:[%s242_s29 + $0x30] sm:$0xff] %v488_v1  ;;  %497 = vst [vmem:[%s242_s29 + $0x38] sm:$0xff] %v489_v2 }
 0x2f5   : > { %725 = shalt.err (!%p722_p10)
}
 0x2f6   : > { %s726_s11 = scalar_lea.hbm %s982_s16, 1024  ;;  %s730_s26 = scalar_lea.hbm %s1032_s5, 2048 }
 0x2f7   : > { %p727_p0 = scmp.ne.s32.totalorder %s982_s16, %s726_s11  ;;  %p731_p1 = scmp.lt.s32.totalorder %s982_s16, %s1032_s5 }
 0x2f8   : > { %p732_p3 = scmp.lt.s32.totalorder %s730_s26, %s726_s11 }
 0x2f9   : > { %p728_p2 = pnand %p727_p0, %p1041_p12 }
 0x2fa   : > { %p733_p6 = por %p732_p3, %p731_p1 }
 0x2fb   : > { %p729_p9 = pneg %p728_p2 }
 0x2fd   : > { %p734_p11 = pnand %p733_p6, %p729_p9 }
 0x2ff   : > { %737 = shalt.err (!%p734_p11)
}
 0x300   : > { %s784_s14 = smov 256   ;;  %s785_s25 = smov 16  }
 0x301   : > { %630 = dma.vmem_to_hbm [thread:$0]  (%p1041_p12), %s977_s12, 1024, %s982_s16, %s499_s22, %s784_s14, %s784_s14, %s785_s25  }
 0x302 PF: > { %s527_s15 = sand.u32 1, %s764_s18   ;;  %p1042_p13 = scmp.ne.s32.totalorder %s1038_s6, 0 }
 0x303   : > { %p1043_p4 = scmp.ge.s32.totalorder %s776_s21, 2  ;;  %s528_s8 = scalar_lea.sflag [#allocation4], %s527_s15 }
 0x305   : > { %p637_p5 = pnand %p1043_p4, %p1042_p13 }
 0x307   : > { %p638_p7 = pneg %p637_p5 }
 0x309   : > { %759 = dma.done.wait (%p638_p7), %s528_s8, 1024  }
 0x30a   : > { %761 = vsyncadd (%p638_p7), %s528_s8, 4294966272  ;;  %p18_p8 = scmp.ge.s32.totalorder %s841_s24, 4   ;;  %s1044_s18 = smov %s768_s19 }
 0x30b   : > { %s1045_s19 = smov %s772_s20  ;;  %s1046_s20 = smov %s853_s27 }
 0x30c   : > { %s1047_s21 = smov %s841_s24  ;;  %20 = sbr.rel (!%p18_p8) target bundleno = 5 (0x5), region = 85 }
 0x311   :  { %533 = vsyncpa [#allocation3], 1 }
 0x312   :  { %535 = vsyncpa [#allocation3 + $0x1], 1 }
 0x313   :  { %536 = vsyncpa [#allocation4], 1 }
 0x314   :  { %538 = vsyncpa [#allocation4 + $0x1], 1 }

</bundles_post_ra>
